<compile_context>
chip_gen: v6e
topology: v6e:2x2x1
jax: 0.10.0
libtpu: 0.0.40
codegen_flags: <defaults>
</compile_context>

<pallas_src>
import functools

import jax
import jax.numpy as jnp
from jax.experimental import pallas as pl
from jax.experimental.pallas import tpu as pltpu


def _round_up(x, m):
    return (x + m - 1) // m * m


def _transition_kernel(x_ref, scale_ref, shift_ref, w_ref, pool_ref, o_ref, *,
                       n_chunks, chunk_in, chunk_out, pool_first):
    """One (batch, row-block) grid step; NCHW-flat layout end to end.

    x_ref:     (1, C, S)              S = 2*hb*W flat input spatial slab
    scale_ref: (C, 1)                 folded BN scale
    shift_ref: (C, 1)                 folded BN shift
    w_ref:     (Cout, C)              1x1 conv weight (matmul dtype)
    pool_ref:  (chunk_in, chunk_out)  chunk-local 0/0.25 avg-pool matrix
    o_ref:     (1, Cout, M)           M = hb*Wo pooled spatial, flat on lanes
    """
    scale = scale_ref[...]
    shift = shift_ref[...]
    w = w_ref[...]
    pool = pool_ref[...]
    mm_dtype = w.dtype

    # Static unroll over spatial chunks: keeps the pooling-matmul N dim small
    # (bounded extra MXU flops) and keeps per-chunk temporaries small so big
    # DMA blocks still fit VMEM (important on v7x's 64 MiB).
    for k in range(n_chunks):
        s0 = k * chunk_in
        d0 = k * chunk_out
        xc = x_ref[0, :, s0:s0 + chunk_in]                       # (C, chunk_in)
        zc = jnp.maximum(xc * scale + shift, 0.0)                # BN + ReLU (VPU)
        zc = zc.astype(mm_dtype)                                 # single cast
        if pool_first:
            # pool (MXU) then 1x1 conv (MXU) on the 4x smaller activations
            a = jnp.dot(zc, pool, preferred_element_type=jnp.float32)
            y = jnp.dot(w, a.astype(mm_dtype),
                        preferred_element_type=jnp.float32)      # (Cout, chunk_out)
        else:
            # 1x1 conv (MXU) then pool (MXU)  -- torch's literal order
            u = jnp.dot(w, zc, preferred_element_type=jnp.float32)
            y = jnp.dot(u.astype(mm_dtype), pool,
                        preferred_element_type=jnp.float32)      # (Cout, chunk_out)
        o_ref[0, :, d0:d0 + chunk_out] = y.astype(o_ref.dtype)


def _pick_ho_block(n_batch, ho, wo, w, c, itemsize, target_bytes):
    # Valid blocks: divide Ho, and keep the input/output block last dims either
    # full or a multiple of 128 lanes (Pallas (8,128) rule + lane-dense DMAs).
    valid = [d for d in range(1, ho + 1)
             if ho % d == 0 and (d == ho or (d * wo) % 128 == 0)]

    def blk_bytes(d):
        return _round_up(c, 8) * _round_up(2 * d * w, 128) * itemsize

    fitting = [d for d in valid if blk_bytes(d) <= target_bytes]
    if not fitting:
        return min(valid)
    if n_batch == 1:
        multi = [d for d in fitting if d < ho]   # give the 2nd TC (v7x) work
        if multi:
            return max(multi)
    return max(fitting)


def _pick_chunk_rows(ho_block, wo, target_lanes=256):
    cands = [d for d in range(1, ho_block + 1)
             if ho_block % d == 0 and d * wo <= target_lanes]
    return max(cands) if cands else 1


def transition_forward(x_nchw, gamma, beta, running_mean, running_var, conv_w,
                       *, eps=1e-5, matmul_dtype=jnp.bfloat16,
                       ho_block=None, chunk_rows=None,
                       target_block_bytes=4 << 20):
    """x_nchw: (N, Cin, H, W); conv_w: (Cout, Cin, 1, 1) -> (N, Cout, H//2, W//2)."""
    N, C, H, W = x_nchw.shape
    Cout = conv_w.shape[0]
    if H % 2 or W % 2:
        raise NotImplementedError("odd H/W")  # TODO(synk): torch drops last row/col
    Ho, Wo = H // 2, W // 2
    itemsize = jnp.dtype(x_nchw.dtype).itemsize
    mm_item = jnp.dtype(matmul_dtype).itemsize

    # ---- fold eval-mode BN into a per-channel scale/shift --------------------
    inv_std = jax.lax.rsqrt(running_var.astype(jnp.float32) + eps)
    scale_f = gamma.astype(jnp.float32) * inv_std
    shift_f = beta.astype(jnp.float32) - running_mean.astype(jnp.float32) * scale_f
    scale = scale_f.astype(x_nchw.dtype).reshape(C, 1)
    shift = shift_f.astype(x_nchw.dtype).reshape(C, 1)

    # ---- 1x1 conv weight in matmul orientation --------------------------------
    w = conv_w[:, :, 0, 0].astype(matmul_dtype)               # (Cout, C)

    # ---- block / chunk selection ----------------------------------------------
    if ho_block is None:
        ho_block = _pick_ho_block(N, Ho, Wo, W, C, itemsize, target_block_bytes)
    assert Ho % ho_block == 0
    assert ho_block == Ho or (ho_block * Wo) % 128 == 0, (ho_block, Wo)

    if chunk_rows is None:
        chunk_rows = _pick_chunk_rows(ho_block, Wo)
    assert ho_block % chunk_rows == 0
    n_chunks = ho_block // chunk_rows
    chunk_in = 2 * chunk_rows * W          # un-pooled flat spatial per chunk
    chunk_out = chunk_rows * Wo            # pooled flat spatial per chunk

    S = 2 * ho_block * W                   # un-pooled flat spatial per block
    M = ho_block * Wo                      # pooled flat spatial per block
    grid = (N, Ho // ho_block)

    # ---- chunk-local averaging matrix (folds the 0.25 avg-pool factor) --------
    s_idx = jnp.arange(chunk_in)
    m_idx = jnp.arange(chunk_out)
    row_match = ((s_idx[:, None] // W) // 2) == (m_idx[None, :] // Wo)
    col_match = ((s_idx[:, None] % W) // 2) == (m_idx[None, :] % Wo)
    pool = (row_match & col_match).astype(matmul_dtype) * jnp.asarray(
        0.25, matmul_dtype)

    # ---- pick the cheaper MXU ordering (identical math) -----------------------
    flops_first = C * chunk_in * chunk_out + Cout * C * chunk_out
    flops_after = Cout * C * chunk_in + Cout * chunk_in * chunk_out
    pool_first = flops_first < flops_after

    # ---- free reshape: NCHW stays NCHW, spatial flattened ----------------------
    x_flat = x_nchw.reshape(N, C, H * W)

    # ---- VMEM budget: double-buffered blocks + params + per-chunk temporaries --
    in_blk = _round_up(C, 8) * _round_up(S, 128) * itemsize
    out_blk = _round_up(Cout, 8) * _round_up(M, 128) * itemsize
    par = (_round_up(Cout, 8) * _round_up(C, 128) * mm_item
           + _round_up(chunk_in, 8) * _round_up(chunk_out, 128) * mm_item
           + 2 * _round_up(C, 8) * 128 * itemsize)
    tmp = ((_round_up(C, 8) + _round_up(Cout, 8))
           * _round_up(chunk_in, 128) * (4 + mm_item))
    need = 2 * (in_blk + out_blk) + par + 2 * tmp
    vmem_limit = int(min(max(2 * need, 16 << 20), 32 << 20))

    kernel = functools.partial(_transition_kernel,
                               n_chunks=n_chunks, chunk_in=chunk_in,
                               chunk_out=chunk_out, pool_first=pool_first)
    out = pl.pallas_call(
        kernel,
        out_shape=jax.ShapeDtypeStruct((N, Cout, Ho * Wo), x_nchw.dtype),
        grid_spec=pltpu.PrefetchScalarGridSpec(
            num_scalar_prefetch=0,
            grid=grid,
            in_specs=[
                pl.BlockSpec((1, C, S), lambda n, r: (n, 0, r)),
                pl.BlockSpec((C, 1), lambda n, r: (0, 0)),
                pl.BlockSpec((C, 1), lambda n, r: (0, 0)),
                pl.BlockSpec((Cout, C), lambda n, r: (0, 0)),
                pl.BlockSpec((chunk_in, chunk_out), lambda n, r: (0, 0)),
            ],
            out_specs=pl.BlockSpec((1, Cout, M), lambda n, r: (n, 0, r)),
        ),
        compiler_params=pltpu.CompilerParams(
            dimension_semantics=("parallel", "parallel"),
            vmem_limit_bytes=vmem_limit,
        ),
    )(x_flat, scale, shift, w, pool)

    # free reshape, no transpose: output is already NCHW
    return out.reshape(N, Cout, Ho, Wo)


def transition_reference(x_nchw, gamma, beta, running_mean, running_var, conv_w,
                         eps=1e-5):
    """Plain-JAX reference mirroring the PyTorch forward (eval-mode BN)."""
    N, Cin, H, W = x_nchw.shape
    Cout = conv_w.shape[0]
    z = (x_nchw - running_mean[None, :, None, None]) / jnp.sqrt(
        running_var[None, :, None, None] + eps)
    z = z * gamma[None, :, None, None] + beta[None, :, None, None]
    z = jnp.maximum(z, 0.0)
    y = jnp.einsum("nchw,oc->nohw", z, conv_w[:, :, 0, 0])
    y = y.reshape(N, Cout, H // 2, 2, W // 2, 2).mean(axis=(3, 5))
    return y


if __name__ == "__main__":
    def run_case(key, N, C, H, W, Cout, rtol, atol, **kwargs):
        kx, kg, kb, km, kv, kw = jax.random.split(key, 6)
        x = jax.random.normal(kx, (N, C, H, W), dtype=jnp.float32)
        gamma = jax.random.normal(kg, (C,), dtype=jnp.float32) * 0.1 + 1.0
        beta = jax.random.normal(kb, (C,), dtype=jnp.float32) * 0.1
        mean = jax.random.normal(km, (C,), dtype=jnp.float32) * 0.1
        var = jnp.abs(jax.random.normal(kv, (C,), dtype=jnp.float32)) * 0.5 + 0.5
        w = jax.random.normal(kw, (Cout, C, 1, 1), dtype=jnp.float32) * 0.1
        out = jax.block_until_ready(
            transition_forward(x, gamma, beta, mean, var, w, **kwargs))
        ref = transition_reference(x, gamma, beta, mean, var, w)
        assert out.shape == (N, Cout, H // 2, W // 2), out.shape
        err = float(jnp.max(jnp.abs(out - ref)))
        assert jnp.allclose(out, ref, rtol=rtol, atol=atol), err

    key = jax.random.PRNGKey(0)
    k1, k2, k3 = jax.random.split(key, 3)
    # Primary config of the module (inplanes=4, outplanes=8): tiny channels,
    # f32 matmuls, single chunk, pool-before-conv path.  grid = (2, 1).
    run_case(k1, N=2, C=4, H=16, W=16, Cout=8, rtol=1e-2, atol=2e-3,
             matmul_dtype=jnp.float32)
    # Larger-channel config: default bf16 MXU path, conv-before-pool order.
    run_case(k2, N=2, C=64, H=16, W=16, Cout=32, rtol=2e-2, atol=2e-2)
    # Exercise row-block tiling (ho_block < Ho, lane-aligned) and the
    # multi-chunk inner loop with f32 matmuls.  grid = (2, 2), 2 chunks/block.
    run_case(k3, N=2, C=32, H=32, W=32, Cout=16, rtol=1e-2, atol=2e-3,
             matmul_dtype=jnp.float32, ho_block=8, chunk_rows=4)
    print("KERNEL_OK")
</pallas_src>

<mosaic_0001>
module attributes {stable_mosaic.version = 11 : i64} {
  func.func @_transition_kernel(%arg0: i32, %arg1: i32, %arg2: memref<1x4x256xf32, #tpu.memory_space<vmem>>, %arg3: memref<4x1xf32, #tpu.memory_space<vmem>>, %arg4: memref<4x1xf32, #tpu.memory_space<vmem>>, %arg5: memref<8x4xf32, #tpu.memory_space<vmem>>, %arg6: memref<256x64xf32, #tpu.memory_space<vmem>>, %arg7: memref<1x8x64xf32, #tpu.memory_space<vmem>>) attributes {dimension_semantics = [#tpu.dimension_semantics<parallel>, #tpu.dimension_semantics<parallel>], iteration_bounds = array<i64: 2, 1>, scalar_prefetch = 0 : i64, scratch_operands = 0 : i64, tpu.core_type = #tpu.core_type<tc>, window_params = [{transform_indices = @transform_0, window_bounds = array<i64: 1, 4, 256>}, {pipeline_mode = #tpu.pipeline_mode<synchronous>, transform_indices = @transform_1, window_bounds = array<i64: 4, 1>}, {pipeline_mode = #tpu.pipeline_mode<synchronous>, transform_indices = @transform_2, window_bounds = array<i64: 4, 1>}, {pipeline_mode = #tpu.pipeline_mode<synchronous>, transform_indices = @transform_3, window_bounds = array<i64: 8, 4>}, {pipeline_mode = #tpu.pipeline_mode<synchronous>, transform_indices = @transform_4, window_bounds = array<i64: 256, 64>}, {transform_indices = @transform_5, window_bounds = array<i64: 1, 8, 64>}]} {
    %c0 = arith.constant 0 : index
    %c0_0 = arith.constant 0 : index
    %0 = vector.load %arg3[%c0, %c0_0] : memref<4x1xf32, #tpu.memory_space<vmem>>, vector<4x1xf32>
    %c0_1 = arith.constant 0 : index
    %c0_2 = arith.constant 0 : index
    %1 = vector.load %arg4[%c0_1, %c0_2] : memref<4x1xf32, #tpu.memory_space<vmem>>, vector<4x1xf32>
    %c0_3 = arith.constant 0 : index
    %c0_4 = arith.constant 0 : index
    %2 = vector.load %arg5[%c0_3, %c0_4] : memref<8x4xf32, #tpu.memory_space<vmem>>, vector<8x4xf32>
    %c0_5 = arith.constant 0 : index
    %c0_6 = arith.constant 0 : index
    %3 = vector.load %arg6[%c0_5, %c0_6] : memref<256x64xf32, #tpu.memory_space<vmem>>, vector<256x64xf32>
    %c0_7 = arith.constant 0 : index
    %c0_8 = arith.constant 0 : index
    %c0_9 = arith.constant 0 : index
    %4 = vector.load %arg2[%c0_7, %c0_8, %c0_9] : memref<1x4x256xf32, #tpu.memory_space<vmem>>, vector<1x4x256xf32>
    %5 = vector.shape_cast %4 : vector<1x4x256xf32> to vector<4x256xf32>
    %6 = vector.broadcast %0 : vector<4x1xf32> to vector<4x256xf32>
    %7 = arith.mulf %5, %6 : vector<4x256xf32>
    %8 = vector.broadcast %1 : vector<4x1xf32> to vector<4x256xf32>
    %9 = arith.addf %7, %8 : vector<4x256xf32>
    %cst = arith.constant 0.000000e+00 : f32
    %10 = vector.broadcast %cst : f32 to vector<4x256xf32>
    %11 = arith.maximumf %9, %10 : vector<4x256xf32>
    %cst_10 = arith.constant dense<0.000000e+00> : vector<4x64xf32>
    %12 = tpu.matmul %11, %3, %cst_10 {dimension_numbers = #tpu.dot_dimension_numbers<[1], [0], [0], [1], [0, 0, 1, 1], [], []>} : vector<4x256xf32>, vector<256x64xf32>, vector<4x64xf32> -> vector<4x64xf32>
    %cst_11 = arith.constant dense<0.000000e+00> : vector<8x64xf32>
    %13 = tpu.matmul %2, %12, %cst_11 {dimension_numbers = #tpu.dot_dimension_numbers<[1], [0], [0], [1], [0, 0, 1, 1], [], []>} : vector<8x4xf32>, vector<4x64xf32>, vector<8x64xf32> -> vector<8x64xf32>
    %c0_12 = arith.constant 0 : index
    %c0_13 = arith.constant 0 : index
    %c0_14 = arith.constant 0 : index
    %14 = vector.load %arg7[%c0_12, %c0_13, %c0_14] : memref<1x8x64xf32, #tpu.memory_space<vmem>>, vector<1x8x64xf32>
    %15 = vector.shape_cast %14 : vector<1x8x64xf32> to vector<8x64xf32>
    %16 = vector.shape_cast %13 : vector<8x64xf32> to vector<1x8x64xf32>
    tpu.vector_store %arg7[%c0_12, %c0_13, %c0_14], %16 {strides = array<i32>} : memref<1x8x64xf32, #tpu.memory_space<vmem>>, vector<1x8x64xf32>,
    return
  }
  func.func @transform_0(%arg0: i32, %arg1: i32) -> (i32, i32, i32) {
    %c0_i32 = arith.constant 0 : i32
    %c0_i32_0 = arith.constant 0 : i32
    return %arg0, %c0_i32, %arg1 : i32, i32, i32
  }
  func.func @transform_1(%arg0: i32, %arg1: i32) -> (i32, i32) {
    %c0_i32 = arith.constant 0 : i32
    %c0_i32_0 = arith.constant 0 : i32
    %c0_i32_1 = arith.constant 0 : i32
    return %c0_i32, %c0_i32_0 : i32, i32
  }
  func.func @transform_2(%arg0: i32, %arg1: i32) -> (i32, i32) {
    %c0_i32 = arith.constant 0 : i32
    %c0_i32_0 = arith.constant 0 : i32
    %c0_i32_1 = arith.constant 0 : i32
    return %c0_i32, %c0_i32_0 : i32, i32
  }
  func.func @transform_3(%arg0: i32, %arg1: i32) -> (i32, i32) {
    %c0_i32 = arith.constant 0 : i32
    %c0_i32_0 = arith.constant 0 : i32
    %c0_i32_1 = arith.constant 0 : i32
    return %c0_i32, %c0_i32_0 : i32, i32
  }
  func.func @transform_4(%arg0: i32, %arg1: i32) -> (i32, i32) {
    %c0_i32 = arith.constant 0 : i32
    %c0_i32_0 = arith.constant 0 : i32
    %c0_i32_1 = arith.constant 0 : i32
    return %c0_i32, %c0_i32_0 : i32, i32
  }
  func.func @transform_5(%arg0: i32, %arg1: i32) -> (i32, i32, i32) {
    %c0_i32 = arith.constant 0 : i32
    %c0_i32_0 = arith.constant 0 : i32
    return %arg0, %c0_i32, %arg1 : i32, i32, i32
  }
}

</mosaic_0001>

<bundles_post_ra>
// kernel: tpu_custom_call.1
= control target key start
LH: loop header
LB: loop body
LE: loop exit
PB: predicated region body
PF: predicated region fallthrough
CT: control target
= control target key end

     0   :  { %10 = vsyncpa [#allocation3], 0  ;;  %s1004_s0 = inlined_call_operand.vmem [shape: f32[2,4,256], index: 0, kind: input, shape index: {}]   ;;  %s1005_s1 = inlined_call_operand.vmem [shape: f32[4,1], index: 1, kind: input, shape index: {}]   ;;  %s1006_s2 = inlined_call_operand.vmem [shape: f32[4,1], index: 2, kind: input, shape index: {}]   ;;  %s1007_s3 = inlined_call_operand.vmem [shape: f32[8,4], index: 3, kind: input, shape index: {}]   ;;  %s1008_s4 = inlined_call_operand.vmem [shape: f32[256,64], index: 4, kind: input, shape index: {}]   ;;  %s1009_s5 = inlined_call_operand.hbm [shape: f32[2,8,64], index: 5, kind: output, shape index: {}]  }
   0x1   :  { %12 = vsyncpa [#allocation3 + $0x1], 0  ;;  %s788_s18 = smov 0   ;;  %s790_s19 = smov 0  }
   0x2   :  { %s792_s20 = smov 0   ;;  %s794_s21 = smov 0  }
   0x3   :  { %s796_s22 = smov 0   ;;  %s798_s23 = smov 0  }
   0x4 LB: > { %s558_s24 = sadd.s32 4294967295, %s751_s23   ;;  %s559_s25 = sadd.s32 4294967294, %s751_s23   ;;  %s751_s23 = sphi %s798_s23, %s18_s23   ;;  %s747_s22 = sphi %s796_s22, %s1016_s22   ;;  %s743_s21 = sphi %s794_s21, %s1015_s21   ;;  %s739_s20 = sphi %s792_s20, %s1014_s20   ;;  %s735_s19 = sphi %s790_s19, %s1013_s19   ;;  %s731_s18 = sphi %s788_s18, %s1012_s18  }
   0x5   : > { %s30_s26 = sadd.s32 1, %s747_s22  ;;  %s151_s27 = sadd.s32 1, %s739_s20 }
   0x6   : > { %p32_p0 = scmp.ge.s32.totalorder %s30_s26, 2  ;;  %p161_p1 = scmp.ne.s32.totalorder %s739_s20, %s735_s19 }
   0x7   : > { %p162_p2 = scmp.eq.s32.totalorder %s558_s24, 1  ;;  %p167_p3 = scmp.ne.s32.totalorder %s735_s19, %s731_s18 }
   0x8   : > { %s1018_s26 = smov (%p32_p0, %s30_s26), 0  ;;  %p168_p5 = scmp.eq.s32.totalorder %s559_s25, 1 }
   0x9   : > { %p828_p4 = por %p162_p2, %p161_p1  ;;  %s146_s29 = ssub.s32 %s747_s22, %s1018_s26 }
   0xa   : > { %p562_p6 = scmp.ge.s32.totalorder %s751_s23, 1  ;;  %p149_p7 = scmp.eq.s32.totalorder %s146_s29, 0 }
   0xb   : > { %p835_p8 = por %p168_p5, %p167_p3  ;;  %p211_p9 = scmp.lt.s32.totalorder %s751_s23, 3 }
   0xc   : > { %s841_s6 = scalar_select %p149_p7, %s739_s20, %s151_s27  }
   0xd   : > { %p212_p10 = pnand %p562_p6, %p211_p9 }
   0xe   : > { %p244_p11 = scmp.lt.s32.totalorder (!%p212_p10), %s743_s21, 1  ;;  %s240_s7 = sand.u32 (!%p212_p10), 1, %s735_s19  }
   0xf   : > { %215 = sbr.rel (%p212_p10) target bundleno = 564 (0x234), region = 40  ;;  %s563_s8 = sshll.u32 (!%p212_p10), %s240_s7, 3 }
  0x10   : > { %s569_s9 = sshll.u32 (!%p212_p10), %s743_s21, 7  ;;  %s242_s10 = scalar_lea.vmem (!%p212_p10), [#allocation2], %s563_s8 }
  0x11   : > { %s484_s11 = sshll.u32 (!%p212_p10), %s242_s10, 4  ;;  %s958_s14 = scalar_lea.hbm (!%p212_p10), %s1009_s5, %s569_s9  ;;  %s960_s11 = int_to_ptr.vmem [resolvable:$true] %s484_s11 }
  0x14   : > { %v253_v0 = vld [vmem:[%s1005_s1] sm:$0xf]  ;;  %v287_v1 = vld [vmem:[%s1008_s4 + $0xf8] sm:$0xff]  ;;  %v753_v2 = vmov 0   ;;  %v286_v4 = vld [vmem:[%s1008_s4 + $0xf0] sm:$0xff]  ;;  %v296_v37 = vlaneseq  ;;  %s245_s15 = scalar_select %p244_p11, %s743_s21, 1 }
  0x15   : > { %674 = vset.pattern.permute.xlu0 %v753_v2  ;;  %573 = vmatprep.subr.mxu0 %v287_v1  ;;  %v271_v3 = vld [vmem:[%s1008_s4 + $0x78] sm:$0xff]  ;;  %v270_v5 = vld [vmem:[%s1008_s4 + $0x70] sm:$0xff]  ;;  %v285_v6 = vld [vmem:[%s1008_s4 + $0xe8] sm:$0xff]  ;;  %v754_v35 = vmov 839922192   ;;  %v755_v50 = vmov 0.0  }
  0x16   : > { %291 = vperm.xlu0 %674, %v253_v0   ;;  %574 = vmatpush3.msra.mxu0 %v271_v3  ;;  %v254_v7 = vld [vmem:[%s1006_s2] sm:$0xf]  ;;  %v269_v8 = vld [vmem:[%s1008_s4 + $0x68] sm:$0xff]  ;;  %v283_v11 = vld [vmem:[%s1008_s4 + $0xd8] sm:$0xff]  ;;  %v294_v36 = vunpack.c.l.s4 %v754_v35  ;;  %v297_v39 = vshrl.u32 %v296_v37, 7  ;;  %s572_s16 = sshll.u32 %s245_s15, 3 }
  0x17   : > { %575 = vmatprep.subr.mxu0 %v286_v4  ;;  %v284_v9 = vld [vmem:[%s1008_s4 + $0xe0] sm:$0xff]  ;;  %v267_v12 = vld [vmem:[%s1008_s4 + $0x58] sm:$0xff]  ;;  %v282_v13 = vld [vmem:[%s1008_s4 + $0xd0] sm:$0xff]  ;;  %s251_s25 = scalar_lea.vmem %s1004_s0, %s572_s16  ;;  %610 = vmatprep.subr.mxu1 %v755_v50  ;;  %vm756_vm0 = vmmov 0   ;;  %vm393_vm1 = vcmask 1043456   ;;  %vm389_vm2 = vcmask 31744  }
  0x18   : > { %576 = vmatpush3.msra.mxu0 %v270_v5  ;;  %v268_v10 = vld [vmem:[%s1008_s4 + $0x60] sm:$0xff]  ;;  %v266_v14 = vld [vmem:[%s1008_s4 + $0x50] sm:$0xff]  ;;  %v281_v15 = vld [vmem:[%s1008_s4 + $0xc8] sm:$0xff]  ;;  %v295_v38 = vunpack.c.0.s8 %v294_v36  ;;  %612 = vmatprep.mubr.msk.f32.mxu1 %vm756_vm0, %v755_v50  ;;  %vm467_vm3 = vcmask 523264   ;;  %s470_s15 = scalar_lea.sflag [#allocation3], %s240_s7  ;;  %s675_s16 = scalar_lea.vmem %s960_s11, 128 }
  0x19   : > { %577 = vmatprep.subr.mxu0 %v285_v6  ;;  %v265_v16 = vld [vmem:[%s1008_s4 + $0x48] sm:$0xff]  ;;  %v280_v17 = vld [vmem:[%s1008_s4 + $0xc0] sm:$0xff]  ;;  %v279_v19 = vld [vmem:[%s1008_s4 + $0xb8] sm:$0xff]  ;;  %p676_p12 = scmp.ne.s32.totalorder %s960_s11, %s675_s16  ;;  %s757_s21 = smov [#allocation2]  }
  0x1a   : > { %304 = vperm.xlu0 %674, %v254_v7   ;;  %578 = vmatpush3.msra.mxu0 %v269_v8  ;;  %v264_v18 = vld [vmem:[%s1008_s4 + $0x40] sm:$0xff]  ;;  %v263_v20 = vld [vmem:[%s1008_s4 + $0x38] sm:$0xff]  ;;  %v278_v21 = vld [vmem:[%s1008_s4 + $0xb0] sm:$0xff]  ;;  %v298_v40 = vsub.s32 %v295_v38, %v297_v39  ;;  %s679_s17 = sshll.u32 %s757_s21, 4  ;;  %s680_s17 = int_to_ptr.vmem [resolvable:$false] %s679_s17 }
  0x1b   : > { %579 = vmatprep.subr.mxu0 %v284_v9  ;;  %v262_v22 = vld [vmem:[%s1008_s4 + $0x30] sm:$0xff]  ;;  %v277_v23 = vld [vmem:[%s1008_s4 + $0xa8] sm:$0xff]  ;;  %v276_v25 = vld [vmem:[%s1008_s4 + $0xa0] sm:$0xff]  ;;  %p677_p13 = pnand %p676_p12, %p828_p4  ;;  %s681_s24 = scalar_lea.vmem %s680_s17, 256 }
  0x1c   : > { %580 = vmatpush3.msra.mxu0 %v268_v10  ;;  %v261_v24 = vld [vmem:[%s1008_s4 + $0x28] sm:$0xff]  ;;  %v260_v26 = vld [vmem:[%s1008_s4 + $0x20] sm:$0xff]  ;;  %v275_v27 = vld [vmem:[%s1008_s4 + $0x98] sm:$0xff]  ;;  %p682_p1 = scmp.lt.s32.totalorder %s960_s11, %s680_s17  ;;  %p683_p2 = scmp.lt.s32.totalorder %s681_s24, %s675_s16 }
  0x1d   : > { %581 = vmatprep.subr.mxu0 %v283_v11  ;;  %v259_v28 = vld [vmem:[%s1008_s4 + $0x18] sm:$0xff]  ;;  %v274_v29 = vld [vmem:[%s1008_s4 + $0x90] sm:$0xff]  ;;  %v273_v31 = vld [vmem:[%s1008_s4 + $0x88] sm:$0xff]  ;;  %p678_p0 = pneg %p677_p13 }
  0x1e   : > { %582 = vmatpush3.msra.mxu0 %v267_v12  ;;  %v258_v30 = vld [vmem:[%s1008_s4 + $0x10] sm:$0xff]  ;;  %v257_v32 = vld [vmem:[%s1008_s4 + $0x8] sm:$0xff]  ;;  %v272_v33 = vld [vmem:[%s1008_s4 + $0x80] sm:$0xff]  ;;  %p684_p3 = por %p683_p2, %p682_p1 }
  0x1f   : > { %583 = vmatprep.subr.mxu0 %v282_v13  ;;  %v256_v34 = vld [vmem:[%s1008_s4] sm:$0xff] }
  0x20   : > { %584 = vmatpush3.msra.mxu0 %v266_v14  ;;  %v288_v43 = vld [vmem:[%s251_s25] sm:$0xff]  ;;  %p685_p5 = pnand %p684_p3, %p678_p0 }
  0x21   : > { %585 = vmatprep.subr.mxu0 %v281_v15  ;;  %v255_v54 = vld [vmem:[%s1007_s3] sm:$0xff] }
  0x22   : > { %586 = vmatpush3.msra.mxu0 %v265_v16 }
  0x23   : > { %587 = vmatprep.subr.mxu0 %v280_v17 }
  0x24   : > { %588 = vmatpush3.msra.mxu0 %v264_v18 }
  0x25   : > { %589 = vmatprep.subr.mxu0 %v279_v19 }
  0x26   : > { %590 = vmatpush3.msra.mxu0 %v263_v20 }
  0x27   : > { %591 = vmatprep.subr.mxu0 %v278_v21 }
  0x28   : > { %592 = vmatpush3.msra.mxu0 %v262_v22 }
  0x29   : > { %593 = vmatprep.subr.mxu0 %v277_v23 }
  0x2a   : > { %594 = vmatpush3.msra.mxu0 %v261_v24 }
  0x2b   : > { %595 = vmatprep.subr.mxu0 %v276_v25 }
  0x2c   : > { %596 = vmatpush3.msra.mxu0 %v260_v26 }
  0x2d   : > { %597 = vmatprep.subr.mxu0 %v275_v27 }
  0x2e   : > { %598 = vmatpush3.msra.mxu0 %v259_v28 }
  0x2f   : > { %599 = vmatprep.subr.mxu0 %v274_v29 }
  0x30   : > { %600 = vmatpush3.msra.mxu0 %v258_v30 }
  0x31   : > { %601 = vmatprep.subr.mxu0 %v273_v31 }
  0x32   : > { %602 = vmatpush3.msra.mxu0 %v257_v32 }
  0x33   : > { %603 = vmatprep.subr.mxu0 %v272_v33 }
  0x34   : > { %604 = vmatpush3.msra.mxu0 %v256_v34 }
  0x91   : > { %v292_v41 = vpop.permute.xlu0 %291 }
  0x92   : > { %v299_v42 = vrot.slane %v292_v41, %v298_v40 }
  0x94   : > { %v301_v45 = vmul.f32 %v299_v42, %v288_v43 }
  0x95   : > { %v305_v44 = vpop.permute.xlu0 %304 }
  0x96   : > { %v312_v46 = vrot.slane %v305_v44, %v298_v40 }
  0x98   : > { %v314_v47 = vadd.f32 %v312_v46, %v301_v45 }
  0x9a   : > { %v315_v48 = vmax.f32 %v314_v47, 0.0 }
  0x9c   : > { %v317_v49 = vcombine.high %v315_v48, %v315_v48 }
  0x9e   : > { %383 = vmatprep.mubr.f32.mxu0 %v317_v49 }
  0x9f   : > { %384 = vmatmul.mubr.f32.vlgmr.msra.gmra.mxu0 %v315_v48 }
 0x15f   : > { %v605_v51 = vpop.f32.mrf.mxu0 }
 0x161   : > { %v606_v52 = vpop.f32.mrf.mxu0 }
 0x162   : > { %v607_v53 = vadd.f32 %v606_v52, %v605_v51 }
 0x164   : > { %611 = vmatpush3.msk.msra.mxu1 %vm393_vm1, %v607_v53 }
 0x165   : > { %613 = vmatmul.mubr.msk.f32.vlgmr.msra.gmra.mxu1 %vm389_vm2, %v255_v54 }
 0x225   : > { %v463_v55 = vpop.f32.mrf.mxu1 }
 0x226   : > { %468 = vst.msk [vmem:[%s242_s10] sm:$0xff] %vm467_vm3, %v463_v55 }
 0x227   : > { %v614_v56 = vpop.f32.mrf.mxu1 }
 0x228   : > { %688 = shalt.err (!%p685_p5)
}
 0x229   : > { %s689_s25 = scalar_lea.hbm %s958_s14, 128  ;;  %s693_s7 = scalar_lea.hbm %s1009_s5, 256 }
 0x22a   : > { %p690_p6 = scmp.ne.s32.totalorder %s958_s14, %s689_s25  ;;  %p694_p10 = scmp.lt.s32.totalorder %s958_s14, %s1009_s5 }
 0x22b   : > { %p695_p11 = scmp.lt.s32.totalorder %s693_s7, %s689_s25 }
 0x22c   : > { %p691_p7 = pnand %p690_p6, %p828_p4 }
 0x22d   : > { %p696_p12 = por %p695_p11, %p694_p10 }
 0x22e   : > { %p692_p9 = pneg %p691_p7 }
 0x230   : > { %p697_p13 = pnand %p696_p12, %p692_p9 }
 0x232   : > { %700 = shalt.err (!%p697_p13)
}
 0x233   : > { %615 = dma.vmem_to_hbm [thread:$0]  (%p828_p4), %s960_s11, 128, %s958_s14, %s470_s15  }
 0x234 PF: > { %p621_p0 = scmp.ge.s32.totalorder %s751_s23, 2  ;;  %s496_s10 = sand.u32 1, %s731_s18  }
 0x235   : > { %s497_s12 = scalar_lea.sflag [#allocation3], %s496_s10 }
 0x236   : > { %p618_p1 = pnand %p621_p0, %p835_p8 }
 0x238   : > { %p619_p2 = pneg %p618_p1 }
 0x23a   : > { %726 = dma.done.wait (%p619_p2), %s497_s12, 128  }
 0x23b   : > { %728 = vsyncadd (%p619_p2), %s497_s12, 4294967168  ;;  %s18_s23 = sadd.s32 1, %s751_s23   ;;  %s1012_s18 = smov %s735_s19 }
 0x23c   : > { %p15_p3 = scmp.ge.s32.totalorder %s18_s23, 4   ;;  %s1013_s19 = smov %s739_s20 }
 0x23d   : > { %s1014_s20 = smov %s841_s6  ;;  %s1015_s21 = smov %s747_s22 }
 0x23e   : > { %s1016_s22 = smov %s1018_s26  ;;  %17 = sbr.rel (!%p15_p3) target bundleno = 4 (0x4), region = 75 }
 0x243   :  { %502 = vsyncpa [#allocation3], 1 }
 0x244   :  { %504 = vsyncpa [#allocation3 + $0x1], 1 }

</bundles_post_ra>
